<compile_context>
chip_gen: v7x
topology: tpu7x:2x2x1
jax: 0.10.0
libtpu: 0.0.40
codegen_flags: <defaults>
</compile_context>

<pallas_src>
import jax
import jax.numpy as jnp
from jax.experimental import pallas as pl
from jax.experimental.pallas import tpu as pltpu


LANE = 128          # lane width: hidden / label padding target
TB = 8              # batch tile (sublane-aligned)
TV = 128            # vocab reduction chunk


def _round_up(x, m):
    return pl.cdiv(x, m) * m


def _pad_to(x, shape):
    return jnp.pad(x, [(0, t - s) for s, t in zip(x.shape, shape)])


def teacher_head_kernel(c_ref, e_ref, w_ref, b_ref, o_ref, acc_ref):
    """Fused pooled-mean (counts @ emb) + classifier + softmax.

    Grid: (batch_tiles [parallel], vocab_chunks [arbitrary reduction]).
      c_ref:   [TB, TV]  f32   scaled token counts (counts / S)
      e_ref:   [TV, Hp]  bf16  embedding-table chunk
      w_ref:   [Hp, Lp]  f32   classifier weight (label_to_idx-permuted, padded)
      b_ref:   [1,  Lp]  f32   classifier bias (padded columns = -1e9)
      o_ref:   [TB, Lp]  f32   per-label probabilities (lane-dense)
      acc_ref: [TB, Hp]  f32   pooled-mean accumulator (VMEM scratch)
    """
    vi = pl.program_id(1)

    @pl.when(vi == 0)
    def _init():
        acc_ref[...] = jnp.zeros_like(acc_ref)

    # Pooled-mean accumulation on the MXU. The bf16 chunk is upcast in VMEM
    # (v5e has no bf16 VALU path); the bandwidth saving is on the HBM side.
    acc_ref[...] += jnp.dot(c_ref[...], e_ref[...].astype(jnp.float32),
                            preferred_element_type=jnp.float32)

    @pl.when(vi == pl.num_programs(1) - 1)
    def _finalize():
        logits = jnp.dot(acc_ref[...], w_ref[...],
                         preferred_element_type=jnp.float32) + b_ref[...]
        m = jnp.max(logits, axis=-1, keepdims=True)
        e = jnp.exp(logits - m)
        denom = jnp.sum(e, axis=-1, keepdims=True)
        o_ref[...] = (e * pl.reciprocal(denom, approx=True)).astype(o_ref.dtype)


def teacher_classifier_probs(counts_scaled, emb_bf16, w_perm, b_perm):
    """counts_scaled [Bp, Vp] f32, emb_bf16 [Vp, Hp] bf16,
    w_perm [Hp, Lp] f32, b_perm [1, Lp] f32  ->  probs [Bp, Lp] f32."""
    Bp, Vp = counts_scaled.shape
    _, Hp = emb_bf16.shape
    Lp = w_perm.shape[1]
    n_b, n_v = Bp // TB, Vp // TV

    cost = pl.CostEstimate(
        flops=2 * Bp * Vp * Hp + 2 * Bp * Hp * Lp,
        transcendentals=Bp * Lp,
        bytes_accessed=(counts_scaled.size * 4 + n_b * emb_bf16.size * 2
                        + w_perm.size * 4 + b_perm.size * 4 + Bp * Lp * 4),
    )

    return pl.pallas_call(
        teacher_head_kernel,
        out_shape=jax.ShapeDtypeStruct((Bp, Lp), jnp.float32),
        grid_spec=pltpu.PrefetchScalarGridSpec(
            num_scalar_prefetch=0,
            grid=(n_b, n_v),
            in_specs=[
                pl.BlockSpec((TB, TV), lambda bi, vi: (bi, vi)),   # counts
                pl.BlockSpec((TV, Hp), lambda bi, vi: (vi, 0)),    # emb chunk
                pl.BlockSpec((Hp, Lp), lambda bi, vi: (0, 0)),     # W (resident)
                pl.BlockSpec((1, Lp), lambda bi, vi: (0, 0)),      # bias
            ],
            out_specs=pl.BlockSpec((TB, Lp), lambda bi, vi: (bi, 0)),
            scratch_shapes=[pltpu.VMEM((TB, Hp), jnp.float32)],
        ),
        compiler_params=pltpu.CompilerParams(
            dimension_semantics=("parallel", "arbitrary"),
            vmem_limit_bytes=32 * 1024 * 1024,
        ),
        cost_estimate=cost,
    )(counts_scaled, emb_bf16, w_perm, b_perm)


def teacher_forward(token_ids, embedding_table, w, b, label_order_to_idx):
    """Forward mirroring TeacherNLPClassifier.forward semantics.

    token_ids:          [B, S] int32  (tokenized "texts")
    embedding_table:    [V, H] float32
    w, b:               classifier params [H, L], [L]
    label_order_to_idx: [L] int32 -- label_to_idx[label] for each model-output
                        label position (the torch scatter loop).
    Returns final [B, L] f32 with final[i, label_to_idx[label]] = prob.
    """
    B, S = token_ids.shape
    V, H = embedding_table.shape
    L = w.shape[1]

    Bp = _round_up(B, TB)
    Vp = _round_up(V, TV)
    Hp = _round_up(H, LANE)
    Lp = _round_up(L, LANE)

    # Glue: per-example token-count matrix (tiny, [B, V]); 1/S mean scale is
    # folded in here so the kernel hot loop is a pure sum + matmuls.
    counts = jnp.zeros((B, V), jnp.float32)
    counts = counts.at[jnp.arange(B)[:, None], token_ids].add(1.0)
    counts_scaled = _pad_to(counts * (1.0 / S), (Bp, Vp))

    # Dominant tensor streamed in bf16.
    emb_bf16 = _pad_to(embedding_table, (Vp, Hp)).astype(jnp.bfloat16)

    # Fold the label_to_idx permutation + lane padding into the classifier:
    # output column label_to_idx[j] gets model-label j's weights/bias; padded
    # columns get bias -1e9 so their softmax probability is exactly 0.
    w_perm = jnp.zeros((Hp, Lp), jnp.float32).at[:H, label_order_to_idx].set(w)
    b_perm = jnp.full((Lp,), -1e9, jnp.float32).at[label_order_to_idx].set(b)
    b_perm = b_perm.reshape(1, Lp)

    probs = teacher_classifier_probs(counts_scaled, emb_bf16, w_perm, b_perm)
    # Output is already in label_to_idx order (permutation folded into W);
    # just drop the batch / label padding.
    return probs[:B, :L]


if __name__ == "__main__":
    # Small deterministic setup: 16 "texts", seq len 16, hidden 32, 8 labels,
    # vocab 512 (exercises 2 batch tiles x 4 vocab-reduction chunks).
    B, S, H, L, V = 16, 16, 32, 8, 512

    key = jax.random.PRNGKey(0)
    k_ids, k_emb, k_w, k_b, k_perm = jax.random.split(key, 5)

    token_ids = jax.random.randint(k_ids, (B, S), 0, V, dtype=jnp.int32)
    embedding_table = jax.random.normal(k_emb, (V, H), jnp.float32) * 0.1
    w = jax.random.normal(k_w, (H, L), jnp.float32) * 0.1
    b = jax.random.normal(k_b, (L,), jnp.float32) * 0.01
    # label_to_idx mapping: model label position -> output column index.
    label_order_to_idx = jax.random.permutation(
        k_perm, jnp.arange(L, dtype=jnp.int32))

    final = teacher_forward(token_ids, embedding_table, w, b, label_order_to_idx)
    final = jax.block_until_ready(final)

    # Pure-JAX reference mirroring the original gather + mean-pool + softmax +
    # scatter path (same bf16-quantized embedding table as the kernel).
    emb_q = embedding_table.astype(jnp.bfloat16).astype(jnp.float32)
    x_emb = jnp.take(emb_q, token_ids, axis=0)               # [B, S, H]
    pooled = jnp.mean(x_emb, axis=1)                         # [B, H]
    logits = pooled @ w + b
    probs_ref = jax.nn.softmax(logits, axis=-1)
    ref = jnp.zeros((B, L), jnp.float32).at[:, label_order_to_idx].set(probs_ref)

    assert final.shape == (B, L)
    # approx reciprocal -> rows sum to 1 within ~1e-3.
    assert jnp.allclose(jnp.sum(final, axis=-1), 1.0, atol=5e-3)
    assert jnp.allclose(final, ref, atol=1e-2)

    # TODO(synk): real BERT tokenization of raw strings / checkpoint load has
    # no Pallas equivalent; the teacher encoder is synthetic (mean-pool head).
    print("KERNEL_OK")
</pallas_src>

<mosaic_0001>
module attributes {stable_mosaic.version = 11 : i64} {
  func.func @teacher_head_kernel(%arg0: i32, %arg1: i32, %arg2: memref<8x128xf32, #tpu.memory_space<vmem>>, %arg3: memref<128x128xbf16, #tpu.memory_space<vmem>>, %arg4: memref<128x128xf32, #tpu.memory_space<vmem>>, %arg5: memref<1x128xf32, #tpu.memory_space<vmem>>, %arg6: memref<8x128xf32, #tpu.memory_space<vmem>>, %arg7: memref<8x128xf32, #tpu.memory_space<vmem>>) attributes {dimension_semantics = [#tpu.dimension_semantics<parallel>, #tpu.dimension_semantics<arbitrary>], iteration_bounds = array<i64: 2, 4>, scalar_prefetch = 0 : i64, scratch_operands = 1 : i64, tpu.core_type = #tpu.core_type<tc>, window_params = [{transform_indices = @transform_0, window_bounds = array<i64: 8, 128>}, {transform_indices = @transform_1, window_bounds = array<i64: 128, 128>}, {pipeline_mode = #tpu.pipeline_mode<synchronous>, transform_indices = @transform_2, window_bounds = array<i64: 128, 128>}, {pipeline_mode = #tpu.pipeline_mode<synchronous>, transform_indices = @transform_3, window_bounds = array<i64: 1, 128>}, {transform_indices = @transform_4, window_bounds = array<i64: 8, 128>}]} {
    %c0_i32 = arith.constant 0 : i32
    %0 = arith.cmpi eq, %arg1, %c0_i32 : i32
    %1 = arith.extui %0 : i1 to i32
    %c0_i32_0 = arith.constant 0 : i32
    %2 = arith.cmpi ne, %1, %c0_i32_0 : i32
    scf.if %2 {
      %cst_9 = arith.constant 0.000000e+00 : f32
      %13 = vector.broadcast %cst_9 : f32 to vector<8x128xf32>
      %c0_10 = arith.constant 0 : index
      %c0_11 = arith.constant 0 : index
      %14 = vector.load %arg7[%c0_10, %c0_11] : memref<8x128xf32, #tpu.memory_space<vmem>>, vector<8x128xf32>
      tpu.vector_store %arg7[%c0_10, %c0_11], %13 {strides = array<i32>} : memref<8x128xf32, #tpu.memory_space<vmem>>, vector<8x128xf32>,
    } else {
    }
    %c0 = arith.constant 0 : index
    %c0_1 = arith.constant 0 : index
    %3 = vector.load %arg7[%c0, %c0_1] : memref<8x128xf32, #tpu.memory_space<vmem>>, vector<8x128xf32>
    %c0_2 = arith.constant 0 : index
    %c0_3 = arith.constant 0 : index
    %4 = vector.load %arg2[%c0_2, %c0_3] : memref<8x128xf32, #tpu.memory_space<vmem>>, vector<8x128xf32>
    %c0_4 = arith.constant 0 : index
    %c0_5 = arith.constant 0 : index
    %5 = vector.load %arg3[%c0_4, %c0_5] : memref<128x128xbf16, #tpu.memory_space<vmem>>, vector<128x128xbf16>
    %6 = arith.extf %5 : vector<128x128xbf16> to vector<128x128xf32>
    %cst = arith.constant dense<0.000000e+00> : vector<8x128xf32>
    %7 = tpu.matmul %4, %6, %cst {dimension_numbers = #tpu.dot_dimension_numbers<[1], [0], [0], [1], [0, 0, 1, 1], [], []>} : vector<8x128xf32>, vector<128x128xf32>, vector<8x128xf32> -> vector<8x128xf32>
    %8 = arith.addf %3, %7 : vector<8x128xf32>
    %c0_6 = arith.constant 0 : index
    %c0_7 = arith.constant 0 : index
    %9 = vector.load %arg7[%c0_6, %c0_7] : memref<8x128xf32, #tpu.memory_space<vmem>>, vector<8x128xf32>
    tpu.vector_store %arg7[%c0_6, %c0_7], %8 {strides = array<i32>} : memref<8x128xf32, #tpu.memory_space<vmem>>, vector<8x128xf32>,
    %c3_i32 = arith.constant 3 : i32
    %10 = arith.cmpi eq, %arg1, %c3_i32 : i32
    %11 = arith.extui %10 : i1 to i32
    %c0_i32_8 = arith.constant 0 : i32
    %12 = arith.cmpi ne, %11, %c0_i32_8 : i32
    scf.if %12 {
      %c0_9 = arith.constant 0 : index
      %c0_10 = arith.constant 0 : index
      %13 = vector.load %arg7[%c0_9, %c0_10] : memref<8x128xf32, #tpu.memory_space<vmem>>, vector<8x128xf32>
      %c0_11 = arith.constant 0 : index
      %c0_12 = arith.constant 0 : index
      %14 = vector.load %arg4[%c0_11, %c0_12] : memref<128x128xf32, #tpu.memory_space<vmem>>, vector<128x128xf32>
      %cst_13 = arith.constant dense<0.000000e+00> : vector<8x128xf32>
      %15 = tpu.matmul %13, %14, %cst_13 {dimension_numbers = #tpu.dot_dimension_numbers<[1], [0], [0], [1], [0, 0, 1, 1], [], []>} : vector<8x128xf32>, vector<128x128xf32>, vector<8x128xf32> -> vector<8x128xf32>
      %c0_14 = arith.constant 0 : index
      %c0_15 = arith.constant 0 : index
      %16 = vector.load %arg5[%c0_14, %c0_15] : memref<1x128xf32, #tpu.memory_space<vmem>>, vector<1x128xf32>
      %17 = vector.broadcast %16 : vector<1x128xf32> to vector<8x128xf32>
      %18 = arith.addf %15, %17 : vector<8x128xf32>
      %cst_16 = arith.constant dense<0xFF800000> : vector<8xf32>
      %19 = vector.multi_reduction <maximumf>, %18, %cst_16 [1] : vector<8x128xf32> to vector<8xf32>
      %20 = vector.shape_cast %19 : vector<8xf32> to vector<8x1xf32>
      %21 = vector.broadcast %20 : vector<8x1xf32> to vector<8x128xf32>
      %22 = arith.subf %18, %21 : vector<8x128xf32>
      %23 = math.exp %22 : vector<8x128xf32>
      %cst_17 = arith.constant dense<0.000000e+00> : vector<8xf32>
      %24 = vector.multi_reduction <add>, %23, %cst_17 [1] : vector<8x128xf32> to vector<8xf32>
      %25 = vector.shape_cast %24 : vector<8xf32> to vector<8x1xf32>
      %26 = tpu.reciprocal %25 {approx = true} : vector<8x1xf32> -> vector<8x1xf32>
      %27 = vector.broadcast %26 : vector<8x1xf32> to vector<8x128xf32>
      %28 = arith.mulf %23, %27 : vector<8x128xf32>
      %c0_18 = arith.constant 0 : index
      %c0_19 = arith.constant 0 : index
      %29 = vector.load %arg6[%c0_18, %c0_19] : memref<8x128xf32, #tpu.memory_space<vmem>>, vector<8x128xf32>
      tpu.vector_store %arg6[%c0_18, %c0_19], %28 {strides = array<i32>} : memref<8x128xf32, #tpu.memory_space<vmem>>, vector<8x128xf32>,
    } else {
    }
    return
  }
  func.func @transform_0(%arg0: i32, %arg1: i32) -> (i32, i32) {
    %c0_i32 = arith.constant 0 : i32
    return %arg0, %arg1 : i32, i32
  }
  func.func @transform_1(%arg0: i32, %arg1: i32) -> (i32, i32) {
    %c0_i32 = arith.constant 0 : i32
    %c0_i32_0 = arith.constant 0 : i32
    return %arg1, %c0_i32 : i32, i32
  }
  func.func @transform_2(%arg0: i32, %arg1: i32) -> (i32, i32) {
    %c0_i32 = arith.constant 0 : i32
    %c0_i32_0 = arith.constant 0 : i32
    %c0_i32_1 = arith.constant 0 : i32
    return %c0_i32, %c0_i32_0 : i32, i32
  }
  func.func @transform_3(%arg0: i32, %arg1: i32) -> (i32, i32) {
    %c0_i32 = arith.constant 0 : i32
    %c0_i32_0 = arith.constant 0 : i32
    %c0_i32_1 = arith.constant 0 : i32
    return %c0_i32, %c0_i32_0 : i32, i32
  }
  func.func @transform_4(%arg0: i32, %arg1: i32) -> (i32, i32) {
    %c0_i32 = arith.constant 0 : i32
    %c0_i32_0 = arith.constant 0 : i32
    return %arg0, %c0_i32 : i32, i32
  }
}

</mosaic_0001>

<bundles_post_ra>
// kernel: tpu_custom_call.1
= control target key start
LH: loop header
LB: loop body
LE: loop exit
PB: predicated region body
PF: predicated region fallthrough
CT: control target
= control target key end

     0   :  { %s1671_s0 = inlined_call_operand.hbm [shape: f32[16,512], index: 0, kind: input, shape index: {}]   ;;  %s1672_s1 = inlined_call_operand.hbm [shape: bf16[512,128], index: 1, kind: input, shape index: {}]   ;;  %s1673_s2 = inlined_call_operand.hbm [shape: f32[128,128], index: 2, kind: input, shape index: {}]   ;;  %s1674_s3 = inlined_call_operand.vmem [shape: f32[1,128], index: 3, kind: input, shape index: {}]   ;;  %s1675_s4 = inlined_call_operand.hbm [shape: f32[16,128], index: 4, kind: output, shape index: {}]  }
   0x1   :  { %1692 = sst [smem:[#allocation23_spill]] %s1673_s2 }
   0x2   :  { %1693 = sst [smem:[#allocation24_spill]] %s1674_s3 }
   0x3   :  { %1694 = sst [smem:[#allocation25_spill]] %s1675_s4 }
   0x4   :  { %9 = vsyncpa [#allocation4], 0 }
   0x5   :  { %11 = vsyncpa [#allocation4 + $0x1], 0 }
   0x6   :  { %12 = vsyncpa [#allocation7], 0 }
   0x7   :  { %14 = vsyncpa [#allocation7 + $0x1], 0 }
   0x8   :  { %15 = vsyncpa [#allocation5], 0 }
   0x9   :  { %17 = vsyncpa [#allocation5 + $0x1], 0  ;;  %s1288_s15 = smov 0   ;;  %s1290_s16 = smov 0  }
   0xa   :  { %s1292_s17 = smov 0   ;;  %s1294_s18 = smov 0  }
   0xb   :  { %s1296_s19 = smov 0   ;;  %s1298_s20 = smov 0  }
   0xc   :  { %s1300_s21 = smov 0   ;;  %s1302_s22 = smov 0  }
   0xd   :  { %s1304_s23 = smov 0   ;;  %s1306_s24 = smov 0  }
   0xe   :  { %s1308_s25 = smov 0   ;;  %s1310_s26 = smov 0  }
   0xf   :  { %s1312_s27 = smov 0   ;;  %s1314_s28 = smov 0  }
  0x10 LB: > { %1695 = sst [smem:[#allocation14_spill]] %s1194_s15  ;;  %s1357_s29 = sadd.s32 4294967295, %s1246_s28   ;;  %s1246_s28 = sphi %s1314_s28, %s23_s28   ;;  %s1242_s27 = sphi %s1312_s27, %s1749_s27   ;;  %s1238_s26 = sphi %s1310_s26, %s1748_s26   ;;  %s1234_s25 = sphi %s1308_s25, %s1747_s25   ;;  %s1230_s24 = sphi %s1306_s24, %s1746_s24   ;;  %s1226_s23 = sphi %s1304_s23, %s1745_s23   ;;  %s1222_s22 = sphi %s1302_s22, %s1744_s22   ;;  %s1218_s21 = sphi %s1300_s21, %s1743_s21   ;;  %s1214_s20 = sphi %s1298_s20, %s1742_s20   ;;  %s1210_s19 = sphi %s1296_s19, %s1741_s19   ;;  %s1206_s18 = sphi %s1294_s18, %s1740_s18   ;;  %s1202_s17 = sphi %s1292_s17, %s1739_s17   ;;  %s1198_s16 = sphi %s1290_s16, %s1738_s16   ;;  %s1194_s15 = sphi %s1288_s15, %s1735_s15  }
  0x11   : > { %1696 = sst [smem:[#allocation15_spill]] %s1198_s16  ;;  %s633_s30 = sadd.s32 4294967294, %s1246_s28  }
  0x12   : > { %1697 = sst [smem:[#allocation16_spill]] %s1230_s24  ;;  %p1678_p0 = scmp.eq.s32.totalorder %s1357_s29, 0 }
  0x13   : > { %1698 = sst [smem:[#allocation17_spill]] %s1234_s25  ;;  %p83_p1 = scmp.ne.s32.totalorder %s1210_s19, %s1206_s18 }
  0x14   : > { %p148_p2 = scmp.ne.s32.totalorder %s1202_s17, %s1198_s16  ;;  %p149_p3 = scmp.eq.s32.totalorder %s1357_s29, 7 }
  0x15   : > { %p1367_p4 = por %p83_p1, %p1678_p0  ;;  %p154_p5 = scmp.ne.s32.totalorder %s1198_s16, %s1194_s15 }
  0x16   : > { %p1373_p6 = por %p149_p3, %p148_p2  ;;  %p155_p7 = scmp.eq.s32.totalorder %s633_s30, 7 }
  0x17   : > { %s1699_s5 = scalar_select %p1367_p4, 1, 0 }
  0x18   : > { %s1701_s6 = scalar_select %p1373_p6, 1, 0 }
  0x19   : > { %1700 = sst [smem:[#allocation18_spill]] %s1699_s5  ;;  %p634_p8 = scmp.ge.s32.totalorder %s1246_s28, 1 }
  0x1a   : > { %1702 = sst [smem:[#allocation19_spill]] %s1701_s6  ;;  %p162_p9 = scmp.lt.s32.totalorder %s1246_s28, 9 }
  0x1b   : > { %p1379_p10 = por %p155_p7, %p154_p5  ;;  %s1248_s9 = smov [#allocation8]  }
  0x1c   : > { %p1383_p11 = pnand %p634_p8, %p162_p9  ;;  %s174_s10 = sshll.u32 %s1248_s9, 4  ;;  %s175_s10 = int_to_ptr.vmem [resolvable:$true] %s174_s10 }
  0x1d   : > { %s1703_s7 = scalar_select %p1379_p10, 1, 0 }
  0x1e   : > { %s1705_s8 = scalar_select %p1383_p11, 1, 0 }
  0x1f   : > { %1704 = sst [smem:[#allocation20_spill]] %s1703_s7  ;;  %p857_p12 = pneg %p1383_p11 }
  0x20   : > { %s1707_s2 = sld [smem:[#allocation23_spill]] }
  0x21   : > { %p1391_p13 = pnand %p857_p12, %p1678_p0 }
  0x23   : > { %p1006_p2 = pneg %p1391_p13 }
  0x26   : > { %s1004_s14 = scalar_lea.hbm %s1707_s2, 2048 }
  0x27   : > { %p1005_p1 = scmp.ne.s32.totalorder %s1707_s2, %s1004_s14  ;;  %p1011_p7 = scmp.lt.u32.totalorder %s1004_s14, %s1707_s2 }
  0x29   : > { %p1007_p3 = pnand %p1006_p2, %p1005_p1 }
  0x2b   : > { %p1008_p5 = pneg %p1007_p3 }
  0x2d   : > { %p1013_p8 = pnand %p1011_p7, %p1008_p5 }
  0x2f   : > { %1016 = shalt.err (!%p1013_p8)
}
  0x30   : > { %s1017_s15 = scalar_lea.vmem %s175_s10, 2048  ;;  %p1025_p10 = scmp.lt.s32.totalorder %s175_s10, %s175_s10 }
  0x31   : > { %p1018_p9 = scmp.ne.s32.totalorder %s175_s10, %s1017_s15  ;;  %p1026_p6 = scmp.lt.s32.totalorder %s1017_s15, %s1017_s15 }
  0x33   : > { %p1020_p12 = pnand %p1018_p9, %p1006_p2  ;;  %p1027_p4 = por %p1026_p6, %p1025_p10 }
  0x35   : > { %p1021_p0 = pneg %p1020_p12 }
  0x37   : > { %p1028_p11 = pnand %p1027_p4, %p1021_p0 }
  0x39   : > { %1031 = shalt.err (!%p1028_p11)
}
  0x3a   : > { %s1249_s12 = smov 128   ;;  %s1250_s7 = smov 8  }
  0x3b   : > { %860 = dma.hbm_to_vmem [thread:$0]  (!%p1391_p13), %s1707_s2, 2048, %s175_s10, [#allocation7], %s1249_s12, %s1249_s12, %s1250_s7  }
  0x3c   : > { %s32_s14 = sadd.s32 1, %s1238_s26  ;;  %s35_s18 = sadd.s32 1, %s1242_s27 }
  0x3d   : > { %p33_p0 = scmp.ge.s32.totalorder %s32_s14, 4  ;;  %s44_s30 = sadd.s32 1, %s1226_s23 }
  0x3e   : > { %p51_p4 = scmp.ne.s32.totalorder %s1226_s23, %s1222_s22  ;;  %p52_p6 = scmp.eq.s32.totalorder %s1246_s28, 0 }
  0x3f   : > { %s1751_s14 = smov (%p33_p0, %s32_s14), 0  ;;  %s1753_s18 = smov (!%p33_p0, %s35_s18), %s1242_s27 }
  0x40   : > { %1708 = sst [smem:[#allocation21_spill]] %s1751_s14  ;;  %s40_s11 = ssub.s32 %s1238_s26, %s1751_s14 }
  0x41   : > { %p1424_p10 = por %p52_p6, %p51_p4  ;;  %p37_p11 = scmp.ge.s32.totalorder %s1753_s18, 2 }
  0x42   : > { %p57_p13 = scmp.ne.s32.totalorder %s1222_s22, %s1218_s21  ;;  %p68_p1 = scmp.eq.s32.totalorder %s40_s11, 0 }
  0x43   : > { %s70_s9 = sadd.s32 1, %s1214_s20  ;;  %s1755_s18 = smov (%p37_p11, %s1753_s18), 0 }
  0x44   : > { %1710 = sst [smem:[#allocation22_spill]] %s1755_s18  ;;  %p1711_p2 = scmp.eq.s32.totalorder %s1357_s29, 0 }
  0x45   : > { %p77_p5 = scmp.ne.s32.totalorder %s1214_s20, %s1210_s19  ;;  %s39_s7 = ssub.s32 %s1242_s27, %s1755_s18 }
  0x46   : > { %p1435_p3 = por %p1711_p2, %p57_p13  ;;  %s138_s15 = sadd.s32 1, %s1202_s17 }
  0x47   : > { %s41_s13 = sor.u32 %s40_s11, %s39_s7  ;;  %p1446_p7 = por %p77_p5, %p52_p6 }
  0x48   : > { %s1712_s12 = scalar_select %p1435_p3, 1, 0 }
  0x49   : > { %p42_p8 = scmp.eq.s32.totalorder %s41_s13, 0  ;;  %p136_p9 = scmp.eq.s32.totalorder %s39_s7, 0 }
  0x4a   : > { %s1451_s2 = scalar_select %p68_p1, %s1214_s20, %s70_s9  }
  0x4b   : > { %s1454_s14 = scalar_select %p42_p8, %s1226_s23, %s44_s30  }
  0x4c   : > { %s1457_s4 = scalar_select %p136_p9, %s1202_s17, %s138_s15  }
  0x4d   : > { %p873_p12 = scmp.lt.s32.totalorder %s1246_s28, 8  ;;  %s191_s18 = sand.u32 1, %s1226_s23  }
  0x4e   : > { %s637_s6 = sshll.u32 %s191_s18, 3  ;;  %s638_s11 = sshll.u32 %s1242_s27, 2 }
  0x4f   : > { %s200_s25 = sadd.s32 %s1238_s26, %s638_s11  ;;  %s195_s3 = scalar_lea.vmem [#allocation3], %s637_s6 }
  0x50   : > { %s204_s24 = sshll.u32 %s195_s3, 4  ;;  %s639_s16 = sshll.u32 %s200_s25, 7  ;;  %s1463_s24 = int_to_ptr.vmem [resolvable:$true] %s204_s24 }
  0x51   : > { %s1468_s7 = scalar_lea.hbm %s1671_s0, %s639_s16  ;;  %p1472_p0 = pnand %p873_p12, %p1424_p10 }
  0x52   : > { %p1478_p4 = pnand %p873_p12, %p1446_p7  ;;  %s211_s25 = sand.u32 1, %s1246_s28  }
  0x53   : > { %s192_s5 = scalar_lea.sflag [#allocation4], %s191_s18  ;;  %s1032_s16 = scalar_lea.hbm %s1468_s7, 128 }
  0x54   : > { %p1033_p6 = scmp.ne.s32.totalorder %s1468_s7, %s1032_s16  ;;  %p1034_p11 = pneg %p1472_p0 }
  0x55   : > { %s1037_s9 = scalar_lea.hbm %s1671_s0, 1024  ;;  %p1038_p1 = scmp.lt.u32.totalorder %s1468_s7, %s1671_s0 }
  0x56   : > { %p1035_p13 = pnand %p1034_p11, %p1033_p6  ;;  %p1039_p2 = scmp.lt.u32.totalorder %s1037_s9, %s1032_s16 }
  0x57   : > { %p1041_p7 = scmp.lt.u32.totalorder %s1032_s16, %s1468_s7 }
  0x58   : > { %p1036_p10 = pneg %p1035_p13  ;;  %p1040_p5 = por %p1039_p2, %p1038_p1 }
  0x5a   : > { %p1042_p8 = por %p1041_p7, %p1040_p5 }
  0x5c   : > { %p1043_p9 = pnand %p1042_p8, %p1036_p10 }
  0x5e   : > { %1046 = shalt.err (!%p1043_p9)
}
  0x5f   : > { %s1047_s18 = scalar_lea.vmem %s1463_s24, 128  ;;  %s1251_s11 = smov [#allocation3]  }
  0x60   : > { %p1048_p12 = scmp.ne.s32.totalorder %s1463_s24, %s1047_s18  ;;  %s1052_s13 = sshll.u32 %s1251_s11, 4  ;;  %s1053_s13 = int_to_ptr.vmem [resolvable:$false] %s1052_s13 }
  0x61   : > { %s1054_s6 = scalar_lea.vmem %s1053_s13, 256  ;;  %p1055_p3 = scmp.lt.s32.totalorder %s1463_s24, %s1053_s13 }
  0x62   : > { %p1050_p6 = pnand %p1048_p12, %p1034_p11  ;;  %p1056_p1 = scmp.lt.s32.totalorder %s1054_s6, %s1047_s18 }
  0x64   : > { %p1051_p13 = pneg %p1050_p6  ;;  %p1057_p2 = por %p1056_p1, %p1055_p3 }
  0x66   : > { %p1058_p5 = pnand %p1057_p2, %p1051_p13 }
  0x68   : > { %1061 = shalt.err (!%p1058_p5)
}
  0x69   : > { %864 = dma.hbm_to_vmem [thread:$0]  (!%p1472_p0), %s1468_s7, 128, %s1463_s24, %s192_s5  }
  0x6a   : > { %s213_s16 = sand.u32 1, %s1214_s20   ;;  %s655_s9 = sshll.u32 %s1238_s26, 10 }
  0x6b   : > { %s640_s10 = sshll.u32 %s213_s16, 6  ;;  %s1513_s18 = scalar_lea.hbm %s1672_s1, %s655_s9 }
  0x6c   : > { %s215_s30 = scalar_lea.vmem [#allocation6], %s640_s10  ;;  %s1519_s13 = scalar_lea.sflag [#allocation7], %s211_s25 }
  0x6d   : > { %s222_s11 = sshll.u32 %s215_s30, 4  ;;  %s1062_s24 = scalar_lea.hbm %s1513_s18, 1024  ;;  %s1515_s11 = int_to_ptr.vmem [resolvable:$true] %s222_s11 }
  0x6e   : > { %p1063_p3 = scmp.ne.s32.totalorder %s1513_s18, %s1062_s24  ;;  %p1064_p0 = pneg %p1478_p4 }
  0x6f   : > { %s1067_s6 = scalar_lea.hbm %s1672_s1, 4096  ;;  %p1068_p7 = scmp.lt.u32.totalorder %s1513_s18, %s1672_s1 }
  0x70   : > { %p1065_p11 = pnand %p1064_p0, %p1063_p3  ;;  %p1069_p8 = scmp.lt.u32.totalorder %s1067_s6, %s1062_s24 }
  0x71   : > { %p1071_p12 = scmp.lt.u32.totalorder %s1062_s24, %s1513_s18 }
  0x72   : > { %p1066_p10 = pneg %p1065_p11  ;;  %p1070_p9 = por %p1069_p8, %p1068_p7 }
  0x74   : > { %p1072_p6 = por %p1071_p12, %p1070_p9 }
  0x76   : > { %p1073_p13 = pnand %p1072_p6, %p1066_p10 }
  0x78   : > { %1076 = shalt.err (!%p1073_p13)
}
  0x79   : > { %s1077_s25 = scalar_lea.vmem %s1515_s11, 1024  ;;  %s1252_s9 = smov [#allocation6]  }
  0x7a   : > { %p1078_p1 = scmp.ne.s32.totalorder %s1515_s11, %s1077_s25  ;;  %s1082_s15 = sshll.u32 %s1252_s9, 4  ;;  %s1083_s15 = int_to_ptr.vmem [resolvable:$false] %s1082_s15 }
  0x7b   : > { %s1084_s21 = scalar_lea.vmem %s1083_s15, 2048  ;;  %p1085_p3 = scmp.lt.s32.totalorder %s1515_s11, %s1083_s15 }
  0x7c   : > { %p1080_p2 = pnand %p1078_p1, %p1064_p0  ;;  %p1086_p11 = scmp.lt.s32.totalorder %s1084_s21, %s1077_s25 }
  0x7e   : > { %p1081_p5 = pneg %p1080_p2  ;;  %p1087_p7 = por %p1086_p11, %p1085_p3 }
  0x80   : > { %p1088_p8 = pnand %p1087_p7, %p1081_p5 }
  0x82   : > { %1091 = shalt.err (!%p1088_p8)
}
  0x83   : > { %s1253_s30 = smov 64   ;;  %s1254_s24 = smov 4  }
  0x84   : > { %867 = dma.hbm_to_vmem [thread:$0]  (!%p1478_p4), %s1513_s18, 1024, %s1515_s11, %s1519_s13, %s1253_s30, %s1253_s30, %s1254_s24  }
  0x85   : > { %p1716_p0 = scmp.ne.s32.totalorder %s1705_s8, 0 }
  0x86   : > { %s236_s7 = sand.u32 (!%p1716_p0), 1, %s1222_s22   ;;  %p1717_p10 = scmp.ne.s32.totalorder (!%p1716_p0), %s1712_s12, 0 }
  0x87   : > { %234 = sbr.rel (%p1716_p0) target bundleno = 979 (0x3d3), region = 36  ;;  %s1550_s5 = sshll.u32 (!%p1716_p0), %s236_s7, 3 }
  0x88   : > { %s237_s6 = scalar_lea.sflag (!%p1716_p0), [#allocation4], %s236_s7  ;;  %s240_s16 = scalar_lea.vmem (!%p1716_p0), [#allocation3], %s1550_s5 }
  0x8e   : > { %1177 = dma.done.wait (%p1717_p10), %s237_s6, 128  }
  0x8f   : > { %1179 = vsyncadd (%p1717_p10), %s237_s6, 4294967168  ;;  %s1718_s3 = sld [smem:[#allocation18_spill]]  ;;  %s245_s18 = sand.u32 1, %s1357_s29  }
  0x90   : > { %s247_s11 = sand.u32 1, %s1210_s19   ;;  %s246_s13 = scalar_lea.sflag [#allocation7], %s245_s18 }
  0x91   : > { %s645_s8 = sshll.u32 %s247_s11, 6 }
  0x92   : > { %s1559_s10 = scalar_lea.vmem [#allocation6], %s645_s8 }
  0x95   : > { %p1719_p4 = scmp.ne.s32.totalorder %s1718_s3, 0 }
  0x97   : > { %1181 = dma.done.wait (%p1719_p4), %s246_s13, 1024  }
  0x98   : > { %1183 = vsyncadd (%p1719_p4), %s246_s13, 4294966272  ;;  %p1720_p9 = scmp.eq.s32.totalorder %s1357_s29, 0 }
  0x9a   : > { %1185 = dma.done.wait (%p1720_p9), [#allocation7], 2048   ;;  %p1721_p12 = pmov %p1720_p9 }
  0x9b   : > { %s1722_s12 = sld [smem:[#allocation15_spill]]  ;;  %s1723_s21 = sld [smem:[#allocation16_spill]] }
  0x9c   : > { %1187 = vsyncadd (%p1721_p12), [#allocation7], 4294965248 }
  0xa1   : > { %s280_s25 = sand.u32 1, %s1722_s12   ;;  %p648_p6 = scmp.ne.s32.totalorder %s1723_s21, 0 }
  0xa2   : > { %s1572_s9 = sshll.u32 %s280_s25, 3  ;;  %v1255_v0 = vmov (!%p648_p6), 0.0  }
  0xa3   : > { %s282_s15 = scalar_lea.vmem [#allocation9], %s1572_s9  ;;  %287 = sbr.rel (%p648_p6) target bundleno = 170 (0xaa), region = 52  ;;  %288 = vst [vmem:[#allocation2] sm:$0xff] (!%p648_p6), %v1255_v0 }
  0xaa PF: > { %v657_v1 = vld [vmem:[%s1559_s10] sm:$0xff]   ;;  %v1256_v2 = vmov 0.0|0.0   ;;  %vm1257_vm0 = vmmov 0   ;;  %v1258_v3 = vmov 0.0   ;;  %v688_v4 = vld [vmem:[%s1559_s10 + $0x8] sm:$0xff]   ;;  %v689_v5 = vld [vmem:[%s1559_s10 + $0x10] sm:$0xff]  }
  0xab   : > { %799 = vmatprep.subr.bf16.mxu0 %v1256_v2  ;;  %761 = vmatprep.mubr.msk.f32.mxu0 %vm1257_vm0, %v1258_v3  ;;  %v690_v6 = vld [vmem:[%s1559_s10 + $0x18] sm:$0xff]   ;;  %v691_v7 = vld [vmem:[%s1559_s10 + $0x20] sm:$0xff]   ;;  %v692_v8 = vld [vmem:[%s1559_s10 + $0x28] sm:$0xff]   ;;  %s1724_s29 = sld [smem:[#allocation16_spill]] }
  0xac   : > { %801 = vmatpush3.bf16.msra.mxu0 %v657_v1  ;;  %v693_v9 = vld [vmem:[%s1559_s10 + $0x30] sm:$0xff]   ;;  %v694_v10 = vld [vmem:[%s1559_s10 + $0x38] sm:$0xff]   ;;  %v289_v12 = vld [vmem:[#allocation2] sm:$0xff] }
  0xad   : > { %802 = vmatprep.subr.bf16.mxu0 %v1256_v2  ;;  %v290_v11 = vld [vmem:[%s240_s16] sm:$0xff] }
  0xb0   : > { %804 = vmatpush3.bf16.msra.mxu0 %v688_v4 }
  0xb1   : > { %805 = vmatprep.subr.bf16.mxu0 %v1256_v2  ;;  %p649_p13 = scmp.ne.s32.totalorder %s1724_s29, 3 }
  0xb2   : > { %v400_v16 = vld [vmem:[#allocation8] sm:$0xff] (!%p649_p13)  ;;  %v401_v17 = vld [vmem:[#allocation8 + $0x8] sm:$0xff] (!%p649_p13)  ;;  %v402_v18 = vld [vmem:[#allocation8 + $0x10] sm:$0xff] (!%p649_p13)  ;;  %v1259_v19 = vmov (!%p649_p13), 0.0|0.0   ;;  %vm1260_vm1 = vmmov (!%p649_p13), 0   ;;  %v1261_v22 = vmov (!%p649_p13), 0.0  }
  0xb3   : > { %v824_v20 = vpack.c.bf16 (!%p649_p13), %v401_v17, %v400_v16  ;;  %v403_v21 = vld [vmem:[#allocation8 + $0x18] sm:$0xff] (!%p649_p13)  ;;  %v404_v24 = vld [vmem:[#allocation8 + $0x20] sm:$0xff] (!%p649_p13)  ;;  %v405_v25 = vld [vmem:[#allocation8 + $0x28] sm:$0xff] (!%p649_p13)  ;;  %s1725_s7 = sld [smem:[#allocation24_spill]] (!%p649_p13) }
  0xb4   : > { %807 = vmatpush3.bf16.msra.mxu0 %v689_v5  ;;  %v827_v23 = vpack.c.bf16 (!%p649_p13), %v403_v21, %v402_v18  ;;  %v830_v26 = vpack.c.bf16 (!%p649_p13), %v405_v25, %v404_v24  ;;  %v406_v27 = vld [vmem:[#allocation8 + $0x30] sm:$0xff] (!%p649_p13)  ;;  %v407_v28 = vld [vmem:[#allocation8 + $0x38] sm:$0xff] (!%p649_p13)  ;;  %v408_v30 = vld [vmem:[#allocation8 + $0x40] sm:$0xff] (!%p649_p13) }
  0xb5   : > { %808 = vmatprep.subr.bf16.mxu0 %v1256_v2  ;;  %v833_v29 = vpack.c.bf16 (!%p649_p13), %v407_v28, %v406_v27  ;;  %v409_v31 = vld [vmem:[#allocation8 + $0x48] sm:$0xff] (!%p649_p13)  ;;  %v410_v33 = vld [vmem:[#allocation8 + $0x50] sm:$0xff] (!%p649_p13)  ;;  %v411_v34 = vld [vmem:[#allocation8 + $0x58] sm:$0xff] (!%p649_p13) }
  0xb6   : > { %v836_v32 = vpack.c.bf16 (!%p649_p13), %v409_v31, %v408_v30  ;;  %v839_v35 = vpack.c.bf16 (!%p649_p13), %v411_v34, %v410_v33  ;;  %v412_v36 = vld [vmem:[#allocation8 + $0x60] sm:$0xff] (!%p649_p13)  ;;  %v413_v37 = vld [vmem:[#allocation8 + $0x68] sm:$0xff] (!%p649_p13)  ;;  %v414_v39 = vld [vmem:[#allocation8 + $0x70] sm:$0xff] (!%p649_p13) }
  0xb7   : > { %v842_v38 = vpack.c.bf16 (!%p649_p13), %v413_v37, %v412_v36  ;;  %v415_v40 = vld [vmem:[#allocation8 + $0x78] sm:$0xff] (!%p649_p13) }
  0xb8   : > { %810 = vmatpush3.bf16.msra.mxu0 %v690_v6  ;;  %v845_v41 = vpack.c.bf16 (!%p649_p13), %v415_v40, %v414_v39 }
  0xb9   : > { %811 = vmatprep.subr.bf16.mxu0 %v1256_v2  ;;  %v650_v43 = vld [vmem:[%s1725_s7] ss:$0 sm:$0xff] (!%p649_p13) }
  0xbc   : > { %813 = vmatpush3.bf16.msra.mxu0 %v691_v7 }
  0xbd   : > { %814 = vmatprep.subr.bf16.mxu0 %v1256_v2 }
  0xc0   : > { %816 = vmatpush3.bf16.msra.mxu0 %v692_v8 }
  0xc1   : > { %817 = vmatprep.subr.bf16.mxu0 %v1256_v2 }
  0xc4   : > { %819 = vmatpush3.bf16.msra.mxu0 %v693_v9 }
  0xc5   : > { %820 = vmatprep.subr.bf16.mxu0 %v1256_v2 }
  0xc8   : > { %822 = vmatpush3.bf16.msra.mxu0 %v694_v10 }
  0xc9   : > { %823 = vmatprep.subr.bf16.mxu0 (!%p649_p13), %v1259_v19 }
  0xcb   : > { %762 = vmatmul.mubr.f32.vlgmr.msra.gmra.mrb[0].mxu0 %v290_v11 }
  0xcc   : > { %796 = vmatprep.mubr.msk.f32.mxu0 (!%p649_p13), %vm1260_vm1, %v1261_v22  ;;  %825 = vmatpush3.bf16.msra.mxu0 (!%p649_p13), %v824_v20 }
  0xcd   : > { %826 = vmatprep.subr.bf16.mxu0 (!%p649_p13), %v1259_v19 }
  0xd0   : > { %828 = vmatpush3.bf16.msra.mxu0 (!%p649_p13), %v827_v23 }
  0xd1   : > { %829 = vmatprep.subr.bf16.mxu0 (!%p649_p13), %v1259_v19 }
  0xd4   : > { %831 = vmatpush3.bf16.msra.mxu0 (!%p649_p13), %v830_v26 }
  0xd5   : > { %832 = vmatprep.subr.bf16.mxu0 (!%p649_p13), %v1259_v19 }
  0xd8   : > { %834 = vmatpush3.bf16.msra.mxu0 (!%p649_p13), %v833_v29 }
  0xd9   : > { %835 = vmatprep.subr.bf16.mxu0 (!%p649_p13), %v1259_v19 }
  0xdc   : > { %837 = vmatpush3.bf16.msra.mxu0 (!%p649_p13), %v836_v32 }
  0xdd   : > { %838 = vmatprep.subr.bf16.mxu0 (!%p649_p13), %v1259_v19 }
  0xe0   : > { %840 = vmatpush3.bf16.msra.mxu0 (!%p649_p13), %v839_v35 }
  0xe1   : > { %841 = vmatprep.subr.bf16.mxu0 (!%p649_p13), %v1259_v19 }
  0xe4   : > { %843 = vmatpush3.bf16.msra.mxu0 (!%p649_p13), %v842_v38 }
  0xe5   : > { %844 = vmatprep.subr.bf16.mxu0 (!%p649_p13), %v1259_v19 }
  0xe8   : > { %846 = vmatpush3.bf16.msra.mxu0 (!%p649_p13), %v845_v41 }
 0x19b   : > { %398 = sbr.rel (%p649_p13) target bundleno = 952 (0x3b8), region = 56 }
 0x19e   : > { %v389_v13 = vpop.f32.mrb[0].mxu0 }
 0x19f   : > { %v393_v14 = vadd.f32 %v389_v13, %v289_v12  ;;  %v763_v15 = vpop.f32.mrb[1].mxu0 }
 0x1a1   : > { %394 = vst [vmem:[#allocation2] sm:$0xff] %v393_v14 }
 0x1a8   : > { %v399_v42 = vld [vmem:[#allocation2] sm:$0xff] }
 0x1a9   : > { %797 = vmatmul.mubr.f32.vlgmr.msra.gmra.mrb[0].mxu0 %v399_v42 }
 0x27c   : > { %v489_v44 = vpop.f32.mrb[0].mxu0 }
 0x27d   : > { %v490_v45 = vadd.f32 %v650_v43, %v489_v44  ;;  %v798_v46 = vpop.f32.mrb[1].mxu0 }
 0x27f   : > { %493 = vmax.xlane.f32.xlu0 %v490_v45 }
 0x30c   : > { %v494_v47 = vpop.xlane.xlu0 %493 }
 0x30d   : > { %v495_v48 = vsub.f32 %v490_v45, %v494_v47 }
 0x30f   : > { %v496_v49 = vmul.f32 1.442695, %v495_v48 }
 0x311   : > { %1000 = vpow2.f32 %v496_v49 }
 0x31b   : > { %v1001_v50 = vpop.eup %1000 }
 0x31c   : > { %498 = vadd.xlane.f32.xlu0 %v1001_v50 }
 0x3a9   : > { %v499_v51 = vpop.xlane.xlu0 %498 }
 0x3aa   : > { %1002 = vrcp.f32 %v499_v51 }
 0x3b4   : > { %v1003_v52 = vpop.eup %1002 }
 0x3b5   : > { %v501_v53 = vmul.f32 %v1003_v52, %v1001_v50 }
 0x3b7   : > { %502 = vst [vmem:[%s282_s15] sm:$0xff] %v501_v53 }
 0x3b8 PF: > { %s1726_s5 = sld [smem:[#allocation17_spill]]  ;;  %s1728_s16 = sld [smem:[#allocation19_spill]] }
 0x3b9   : > { %s1729_s8 = sld [smem:[#allocation25_spill]]  ;;  %s517_s10 = sshll.u32 %s282_s15, 4  ;;  %s518_s10 = int_to_ptr.vmem [resolvable:$true] %s517_s10 }
 0x3ba   : > { %s504_s12 = scalar_lea.sflag [#allocation5], %s280_s25  ;;  %s1092_s21 = scalar_lea.vmem %s518_s10, 128 }
 0x3bb   : > { %p1093_p1 = scmp.ne.s32.totalorder %s518_s10, %s1092_s21  ;;  %s1262_s29 = smov [#allocation9]  }
 0x3bc   : > { %s1096_s30 = sshll.u32 %s1262_s29, 4  ;;  %s1097_s30 = int_to_ptr.vmem [resolvable:$false] %s1096_s30 }
 0x3bd   : > { %s1098_s24 = scalar_lea.vmem %s1097_s30, 256  ;;  %p1099_p11 = scmp.lt.s32.totalorder %s518_s10, %s1097_s30 }
 0x3be   : > { %s652_s3 = sshll.u32 %s1726_s5, 7  ;;  %p1730_p2 = scmp.ne.s32.totalorder %s1728_s16, 0 }
 0x3bf   : > { %s1596_s13 = scalar_lea.hbm %s1729_s8, %s652_s3  ;;  %p1100_p7 = scmp.lt.s32.totalorder %s1098_s24, %s1092_s21 }
 0x3c0   : > { %p1094_p5 = pnand %p1093_p1, %p1730_p2 }
 0x3c1   : > { %p1101_p8 = por %p1100_p7, %p1099_p11 }
 0x3c2   : > { %p1095_p3 = pneg %p1094_p5 }
 0x3c4   : > { %p1102_p0 = pnand %p1101_p8, %p1095_p3 }
 0x3c6   : > { %1105 = shalt.err (!%p1102_p0)
}
 0x3c7   : > { %s1106_s25 = scalar_lea.hbm %s1596_s13, 128  ;;  %s1110_s7 = scalar_lea.hbm %s1729_s8, 256 }
 0x3c8   : > { %p1107_p10 = scmp.ne.s32.totalorder %s1596_s13, %s1106_s25  ;;  %p1111_p12 = scmp.lt.u32.totalorder %s1596_s13, %s1729_s8 }
 0x3c9   : > { %p1112_p6 = scmp.lt.u32.totalorder %s1110_s7, %s1106_s25  ;;  %p1114_p1 = scmp.lt.u32.totalorder %s1106_s25, %s1596_s13 }
 0x3ca   : > { %p1108_p4 = pnand %p1107_p10, %p1730_p2 }
 0x3cb   : > { %p1113_p13 = por %p1112_p6, %p1111_p12 }
 0x3cc   : > { %p1109_p9 = pneg %p1108_p4 }
 0x3cd   : > { %p1115_p5 = por %p1114_p1, %p1113_p13 }
 0x3cf   : > { %p1116_p3 = pnand %p1115_p5, %p1109_p9 }
 0x3d1   : > { %1119 = shalt.err (!%p1116_p3)
}
 0x3d2   : > { %855 = dma.vmem_to_hbm [thread:$0]  (%p1730_p2), %s518_s10, 128, %s1596_s13, %s504_s12  }
 0x3d3 PF: > { %s1731_s3 = sld [smem:[#allocation14_spill]]  ;;  %s1732_s18 = sld [smem:[#allocation20_spill]] }
 0x3d4   : > { %p875_p11 = scmp.ge.s32.totalorder %s1246_s28, 2 }
 0x3d9   : > { %s529_s11 = sand.u32 1, %s1731_s3   ;;  %p1733_p7 = scmp.ne.s32.totalorder %s1732_s18, 0 }
 0x3da   : > { %s530_s21 = scalar_lea.sflag [#allocation5], %s529_s11 }
 0x3db   : > { %p869_p8 = pnand %p875_p11, %p1733_p7 }
 0x3dd   : > { %1189 = dma.done.wait (!%p869_p8), %s530_s21, 128  }
 0x3de   : > { %1191 = vsyncadd (!%p869_p8), %s530_s21, 4294967168  ;;  %s23_s28 = sadd.s32 1, %s1246_s28   ;;  %s1735_s15 = sld [smem:[#allocation15_spill]] }
 0x3df   : > { %p1624_p0 = scmp.ge.s32.totalorder %s23_s28, 10   ;;  %s1736_s13 = sld [smem:[#allocation21_spill]] }
 0x3e0   : > { %s1737_s10 = sld [smem:[#allocation22_spill]]  ;;  %s1738_s16 = smov %s1202_s17 }
 0x3e1   : > { %s1739_s17 = smov %s1457_s4  ;;  %s1740_s18 = smov %s1210_s19 }
 0x3e2   : > { %s1741_s19 = smov %s1214_s20  ;;  %s1742_s20 = smov %s1451_s2 }
 0x3e3   : > { %s1743_s21 = smov %s1222_s22  ;;  %s1744_s22 = smov %s1226_s23 }
 0x3e4   : > { %s1745_s23 = smov %s1454_s14  ;;  %s1746_s24 = smov %s1238_s26 }
 0x3e5   : > { %s1747_s25 = smov %s1242_s27  ;;  %s1748_s26 = smov %s1736_s13 }
 0x3e6   : > { %s1749_s27 = smov %s1737_s10  ;;  %22 = sbr.rel (!%p1624_p0) target bundleno = 16 (0x10), region = 106 }
 0x3ed   :  { %535 = vsyncpa [#allocation4], 1 }
 0x3ee   :  { %537 = vsyncpa [#allocation4 + $0x1], 1 }
 0x3ef   :  { %538 = vsyncpa [#allocation7], 1 }
 0x3f0   :  { %540 = vsyncpa [#allocation7 + $0x1], 1 }
 0x3f1   :  { %541 = vsyncpa [#allocation5], 1 }
 0x3f2   :  { %543 = vsyncpa [#allocation5 + $0x1], 1 }

</bundles_post_ra>
